<compile_context>
chip_gen: v7x
topology: tpu7x:2x2x1
jax: 0.10.0
libtpu: 0.0.40
codegen_flags: <defaults>
</compile_context>

<pallas_src>
import functools

import numpy as np
import jax
import jax.numpy as jnp
from jax.experimental import pallas as pl
from jax.experimental.pallas import tpu as pltpu


# ----------------------------------------------------------------------------
# Kernel: fused LayerNorm(eps=1e-6, affine + centering folded into W) + Linear.
# ----------------------------------------------------------------------------
def _patch_merge_kernel(x_ref, w_ref, bias_ref, colsum_ref, o_ref, *, mxu_dtype):
    x = x_ref[...]                                    # (tm, F) model dtype
    xf = x.astype(jnp.float32)

    # LayerNorm statistics in f32 (v5e has no bf16 VPU path anyway).
    mean = jnp.mean(xf, axis=-1, keepdims=True)                   # (tm, 1)
    meansq = jnp.mean(xf * xf, axis=-1, keepdims=True)            # (tm, 1)
    var = jnp.maximum(meansq - mean * mean, 0.0)                  # biased var
    rstd = jax.lax.rsqrt(var + 1e-6)                              # EUP slot

    # Raw x feeds the MXU (bf16 by default); centering folded via colsum(W).
    xw = jnp.dot(x.astype(mxu_dtype), w_ref[...],
                 preferred_element_type=jnp.float32)              # (tm, Ct)

    # Padded (all-zero) rows: mean=0, xw=0 -> out = bias (finite, sliced off).
    out = rstd * (xw - mean * colsum_ref[...]) + bias_ref[...]
    o_ref[...] = out.astype(o_ref.dtype)


def _round_up(x, m):
    return ((x + m - 1) // m) * m


def _vmem_budget():
    """(tile budget, vmem_limit_bytes, max tile_m) — generation aware."""
    cap = 64 * 1024 * 1024                        # conservative default (v7x)
    try:
        info = pltpu.get_tpu_info()
        cap = int(getattr(info, "vmem_capacity_bytes", cap))
    except Exception:
        pass
    if cap >= 128 * 1024 * 1024:                  # v5e / v6e
        return 96 * 1024 * 1024, 100 * 1024 * 1024, 4096
    return 40 * 1024 * 1024, 48 * 1024 * 1024, 2048   # v7x (64 MiB / TC)


def _pick_tile_m(n, f, tile_n, io_bytes, w_bytes, budget, tm_cap):
    """Largest tile_m (mult of 8) whose pipelined footprint fits the budget."""
    # Resident: double-buffered weight + f32 bias/colsum rows.
    fixed = 2 * f * tile_n * w_bytes + 4 * tile_n * 4
    # Per token row: double-buffered in/out tiles + f32 temporaries
    # (upcast for stats, f32 matmul accumulator).
    per_row = 2 * (f + tile_n) * io_bytes + (f + tile_n) * 4
    tm = (budget - fixed) // max(per_row, 1)
    tm = max(8, (min(tm_cap, int(tm)) // 8) * 8)
    # Keep >= 2 row tiles so a v7x megacore can shard the parallel axis
    # (harmless ~0.35 us extra step on single-TC v5e/v6e).
    tm = min(tm, max(8, _round_up(pl.cdiv(n, 2), 8)))
    return tm


def _norm_reduce_pallas(tokens, w_fold, bias_fold, mxu_dtype):
    """tokens: (N, F) -> (N, C_out) via fused LayerNorm + Linear."""
    n, f = tokens.shape
    c_out = w_fold.shape[1]
    io_bytes = tokens.dtype.itemsize
    w_bytes = np.dtype(mxu_dtype).itemsize

    budget, vmem_limit, tm_cap = _vmem_budget()

    # --- output-channel layout: lane-dense pad only when the waste is small,
    # otherwise emit exactly c_out lanes (skips the post-kernel slice).
    c_pad = _round_up(c_out, 128)
    pad_out = (c_pad == c_out) or ((c_pad - c_out) * 2 <= c_out)
    if pad_out:
        tile_n = c_pad
        # Shrink the output-channel tile until the double-buffered weight fits
        # in half the budget (needed for the deepest stages on v7x).
        while 2 * f * tile_n * w_bytes > budget // 2 and tile_n > 128:
            tile_n = _round_up(tile_n // 2, 128)
        c_k = _round_up(c_out, tile_n)
    else:
        tile_n = c_out
        c_k = c_out
    n_col = c_k // tile_n

    if c_k != c_out:
        w_fold = jnp.pad(w_fold, ((0, 0), (0, c_k - c_out)))
        bias_fold = jnp.pad(bias_fold, (0, c_k - c_out))
    w_p = w_fold.astype(mxu_dtype)                               # (F, Ck)
    bias_p = bias_fold.reshape(1, c_k).astype(jnp.float32)       # (1, Ck)
    # Column sums of the *cast* weight so the centering fold matches the MXU.
    colsum_p = jnp.sum(w_p.astype(jnp.float32), axis=0, keepdims=True)

    # --- token (row) tiling
    tile_m = _pick_tile_m(n, f, tile_n, io_bytes, w_bytes, budget, tm_cap)
    n_pad = _round_up(n, tile_m)
    if n_pad != n:
        tokens = jnp.pad(tokens, ((0, n_pad - n), (0, 0)))

    cost = pl.CostEstimate(
        flops=2 * n_pad * f * c_k,
        transcendentals=n_pad,
        bytes_accessed=n_pad * (f + c_k) * io_bytes + f * c_k * w_bytes,
    )

    out = pl.pallas_call(
        functools.partial(_patch_merge_kernel, mxu_dtype=mxu_dtype),
        out_shape=jax.ShapeDtypeStruct((n_pad, c_k), tokens.dtype),
        grid=(n_pad // tile_m, n_col),
        in_specs=[
            pl.BlockSpec((tile_m, f), lambda i, j: (i, 0)),      # token tile
            pl.BlockSpec((f, tile_n), lambda i, j: (0, j)),      # folded W
            pl.BlockSpec((1, tile_n), lambda i, j: (0, j)),      # beta @ W
            pl.BlockSpec((1, tile_n), lambda i, j: (0, j)),      # colsum(W)
        ],
        out_specs=pl.BlockSpec((tile_m, tile_n), lambda i, j: (i, j)),
        compiler_params=pltpu.CompilerParams(
            dimension_semantics=("parallel", "parallel"),
            vmem_limit_bytes=vmem_limit,
        ),
        cost_estimate=cost,
    )(tokens, w_p, bias_p, colsum_p)

    if n_pad != n or c_k != c_out:
        out = out[:n, :c_out]
    return out


# ----------------------------------------------------------------------------
# Trace-time folding: torch slice-order permutation + LN affine (gamma, beta).
# ----------------------------------------------------------------------------
def _fold_params(gamma, beta, weight, in_channels, merge_last_dim):
    c = in_channels
    if merge_last_dim:
        offsets = [(0, 0, 0), (1, 0, 0), (0, 1, 0), (0, 0, 1),
                   (1, 1, 0), (1, 0, 1), (0, 1, 1), (1, 1, 1)]
        s_of = {off: s for s, off in enumerate(offsets)}
        perm = np.empty(8 * c, dtype=np.int32)
        for dh in range(2):
            for dw in range(2):
                for dd in range(2):
                    for ch in range(c):
                        f_mine = ((dh * 2 + dw) * 2 + dd) * c + ch
                        perm[f_mine] = s_of[(dh, dw, dd)] * c + ch
    else:
        offsets = [(0, 0), (1, 0), (0, 1), (1, 1)]
        s_of = {off: s for s, off in enumerate(offsets)}
        perm = np.empty(4 * c, dtype=np.int32)
        for dh in range(2):
            for dw in range(2):
                for ch in range(c):
                    f_mine = (dh * 2 + dw) * c + ch
                    perm[f_mine] = s_of[(dh, dw)] * c + ch

    gamma_p = gamma[perm]
    beta_p = beta[perm]
    w_p = weight[perm, :]
    w_fold = (gamma_p[:, None] * w_p).astype(jnp.float32)   # gamma into rows
    bias_fold = (beta_p @ w_p).astype(jnp.float32)          # beta into a bias
    return w_fold, bias_fold


def patch_merging_forward(x, gamma, beta, weight, *, merge_last_dim=True,
                          mxu_dtype=jnp.bfloat16, channels_last_output=False):
    """JAX/Pallas equivalent of PatchMerging.forward.

    x:      (b, c, h, w, d)
    gamma:  (F,)  beta: (F,)  with F = 8c (merge_last_dim) or 4c
    weight: (F, out_channels)   (transposed vs torch's (out, in))
    returns (b, out_channels, h//2, w//2, d//2 or d)
            (or channel-last (b, h2, w2, d2, out_channels) if requested)
    """
    b, c, h, w, d = x.shape
    pad_h, pad_w = h % 2, w % 2
    pad_d = d % 2 if merge_last_dim else 0
    if pad_h or pad_w or pad_d:
        x = jnp.pad(x, ((0, 0), (0, 0), (0, pad_h), (0, pad_w), (0, pad_d)))
    _, _, h, w, d = x.shape

    w_fold, bias_fold = _fold_params(gamma, beta, weight, c, merge_last_dim)

    if merge_last_dim:
        h2, w2, d2 = h // 2, w // 2, d // 2
        xr = x.reshape(b, c, h2, 2, w2, 2, d2, 2)
        # channel LAST -> lane-dense materialization of `tokens`
        xt = jnp.transpose(xr, (0, 2, 4, 6, 3, 5, 7, 1))  # (b,h2,w2,d2,2,2,2,c)
        tokens = xt.reshape(b * h2 * w2 * d2, 8 * c)
    else:
        h2, w2, d2 = h // 2, w // 2, d
        xr = x.reshape(b, c, h2, 2, w2, 2, d2)
        xt = jnp.transpose(xr, (0, 2, 4, 6, 3, 5, 1))      # (b,h2,w2,d,2,2,c)
        tokens = xt.reshape(b * h2 * w2 * d2, 4 * c)

    out_tokens = _norm_reduce_pallas(tokens, w_fold, bias_fold, mxu_dtype)

    c_out = weight.shape[1]
    out = out_tokens.reshape(b, h2, w2, d2, c_out)
    if channels_last_output:
        return out
    return jnp.transpose(out, (0, 4, 1, 2, 3))


# ----------------------------------------------------------------------------
# Pure-JAX reference (exact torch path: slices, concat, LN affine, /sqrt).
# ----------------------------------------------------------------------------
def _reference_forward(x, gamma, beta, weight, merge_last_dim=True):
    b, c, h, w, d = x.shape
    x = jnp.pad(x, ((0, 0), (0, 0), (0, h % 2), (0, w % 2),
                    (0, d % 2 if merge_last_dim else 0)))
    _, _, h, w, d = x.shape
    if merge_last_dim:
        sl = [x[:, :, i::2, j::2, k::2] for (i, j, k) in
              [(0, 0, 0), (1, 0, 0), (0, 1, 0), (0, 0, 1),
               (1, 1, 0), (1, 0, 1), (0, 1, 1), (1, 1, 1)]]
        h2, w2, d2 = h // 2, w // 2, d // 2
    else:
        sl = [x[:, :, i::2, j::2, :] for (i, j) in [(0, 0), (1, 0), (0, 1), (1, 1)]]
        h2, w2, d2 = h // 2, w // 2, d
    xm = jnp.concatenate(sl, axis=1)
    t = jnp.transpose(xm, (0, 2, 3, 4, 1)).astype(jnp.float32)  # (b,h2,w2,d2,F)
    mean = jnp.mean(t, axis=-1, keepdims=True)
    var = jnp.mean((t - mean) ** 2, axis=-1, keepdims=True)
    tn = (t - mean) / jnp.sqrt(var + 1e-6) * gamma + beta
    out = jnp.einsum("bhwdf,fo->bhwdo", tn, weight)
    return jnp.transpose(out, (0, 4, 1, 2, 3))


if __name__ == "__main__":
    key = jax.random.PRNGKey(0)
    k_x, k_w, k_g, k_b, k_x2 = jax.random.split(key, 5)

    in_channels = 4
    out_channels = 8
    feat = 8 * in_channels

    x = jax.random.normal(k_x, (2, in_channels, 8, 8, 8), dtype=jnp.float32)
    weight = (jax.random.normal(k_w, (feat, out_channels), dtype=jnp.float32)
              * (1.0 / jnp.sqrt(feat)))
    gamma = 1.0 + 0.05 * jax.random.normal(k_g, (feat,), dtype=jnp.float32)
    beta = 0.05 * jax.random.normal(k_b, (feat,), dtype=jnp.float32)

    ref = _reference_forward(x, gamma, beta, weight, merge_last_dim=True)

    # 1) default fast path (bf16 MXU operands) — bf16-level tolerance
    out = patch_merging_forward(x, gamma, beta, weight, merge_last_dim=True)
    out = jax.block_until_ready(out)
    assert out.shape == (2, out_channels, 4, 4, 4), out.shape
    assert jnp.allclose(out, ref, atol=3e-2, rtol=3e-2), "mismatch (bf16 MXU)"

    # 2) exact-f32 path — tight tolerance proves semantics
    out_f32 = patch_merging_forward(x, gamma, beta, weight, merge_last_dim=True,
                                    mxu_dtype=jnp.float32)
    out_f32 = jax.block_until_ready(out_f32)
    assert jnp.allclose(out_f32, ref, atol=1e-4, rtol=1e-4), "mismatch (f32)"

    # 3) merge_last_dim=False path (f32 MXU, tight tolerance)
    g4, b4, w4 = gamma[:4 * in_channels], beta[:4 * in_channels], weight[:4 * in_channels]
    out2 = patch_merging_forward(x, g4, b4, w4, merge_last_dim=False,
                                 mxu_dtype=jnp.float32)
    out2 = jax.block_until_ready(out2)
    ref2 = _reference_forward(x, g4, b4, w4, merge_last_dim=False)
    assert out2.shape == (2, out_channels, 4, 4, 8), out2.shape
    assert jnp.allclose(out2, ref2, atol=1e-4, rtol=1e-4), "mismatch (no-d merge)"

    # 4) odd spatial dims + bf16 tokens end-to-end (model dtype preserved)
    x_odd = jax.random.normal(k_x2, (1, in_channels, 7, 5, 9), dtype=jnp.bfloat16)
    out3 = patch_merging_forward(x_odd, gamma, beta, weight, merge_last_dim=True)
    out3 = jax.block_until_ready(out3)
    assert out3.shape == (1, out_channels, 4, 3, 5), out3.shape
    assert out3.dtype == jnp.bfloat16
    ref3 = _reference_forward(x_odd.astype(jnp.float32), gamma, beta, weight,
                              merge_last_dim=True)
    assert jnp.allclose(out3.astype(jnp.float32), ref3, atol=1e-1, rtol=1e-1), \
        "mismatch (bf16 e2e / odd dims)"

    print("KERNEL_OK")
</pallas_src>

<mosaic_0001>
module attributes {stable_mosaic.version = 11 : i64} {
  func.func @_patch_merge_kernel(%arg0: i32, %arg1: i32, %arg2: memref<64x32xf32, #tpu.memory_space<vmem>>, %arg3: memref<32x8xbf16, #tpu.memory_space<vmem>>, %arg4: memref<1x8xf32, #tpu.memory_space<vmem>>, %arg5: memref<1x8xf32, #tpu.memory_space<vmem>>, %arg6: memref<64x8xf32, #tpu.memory_space<vmem>>) attributes {dimension_semantics = [#tpu.dimension_semantics<parallel>, #tpu.dimension_semantics<parallel>], iteration_bounds = array<i64: 2, 1>, scalar_prefetch = 0 : i64, scratch_operands = 0 : i64, tpu.core_type = #tpu.core_type<tc>, window_params = [{transform_indices = @transform_0, window_bounds = array<i64: 64, 32>}, {transform_indices = @transform_1, window_bounds = array<i64: 32, 8>}, {transform_indices = @transform_2, window_bounds = array<i64: 1, 8>}, {transform_indices = @transform_3, window_bounds = array<i64: 1, 8>}, {transform_indices = @transform_4, window_bounds = array<i64: 64, 8>}]} {
    %c0 = arith.constant 0 : index
    %c0_0 = arith.constant 0 : index
    %0 = vector.load %arg2[%c0, %c0_0] : memref<64x32xf32, #tpu.memory_space<vmem>>, vector<64x32xf32>
    %cst = arith.constant dense<0.000000e+00> : vector<64xf32>
    %1 = vector.multi_reduction <add>, %0, %cst [1] : vector<64x32xf32> to vector<64xf32>
    %2 = vector.shape_cast %1 : vector<64xf32> to vector<64x1xf32>
    %cst_1 = arith.constant 3.200000e+01 : f32
    %3 = vector.broadcast %cst_1 : f32 to vector<64x1xf32>
    %4 = arith.divf %2, %3 : vector<64x1xf32>
    %5 = arith.mulf %0, %0 : vector<64x32xf32>
    %cst_2 = arith.constant dense<0.000000e+00> : vector<64xf32>
    %6 = vector.multi_reduction <add>, %5, %cst_2 [1] : vector<64x32xf32> to vector<64xf32>
    %7 = vector.shape_cast %6 : vector<64xf32> to vector<64x1xf32>
    %cst_3 = arith.constant 3.200000e+01 : f32
    %8 = vector.broadcast %cst_3 : f32 to vector<64x1xf32>
    %9 = arith.divf %7, %8 : vector<64x1xf32>
    %10 = arith.mulf %4, %4 : vector<64x1xf32>
    %11 = arith.subf %9, %10 : vector<64x1xf32>
    %cst_4 = arith.constant 0.000000e+00 : f32
    %12 = vector.broadcast %cst_4 : f32 to vector<64x1xf32>
    %13 = arith.maximumf %11, %12 : vector<64x1xf32>
    %cst_5 = arith.constant 9.99999997E-7 : f32
    %14 = vector.broadcast %cst_5 : f32 to vector<64x1xf32>
    %15 = arith.addf %13, %14 : vector<64x1xf32>
    %16 = math.rsqrt %15 : vector<64x1xf32>
    %17 = arith.truncf %0 : vector<64x32xf32> to vector<64x32xbf16>
    %c0_6 = arith.constant 0 : index
    %c0_7 = arith.constant 0 : index
    %18 = vector.load %arg3[%c0_6, %c0_7] : memref<32x8xbf16, #tpu.memory_space<vmem>>, vector<32x8xbf16>
    %cst_8 = arith.constant dense<0.000000e+00> : vector<64x8xf32>
    %19 = tpu.matmul %17, %18, %cst_8 {dimension_numbers = #tpu.dot_dimension_numbers<[1], [0], [0], [1], [0, 0, 1, 1], [], []>} : vector<64x32xbf16>, vector<32x8xbf16>, vector<64x8xf32> -> vector<64x8xf32>
    %c0_9 = arith.constant 0 : index
    %c0_10 = arith.constant 0 : index
    %20 = vector.load %arg5[%c0_9, %c0_10] : memref<1x8xf32, #tpu.memory_space<vmem>>, vector<1x8xf32>
    %21 = vector.broadcast %4 : vector<64x1xf32> to vector<64x8xf32>
    %22 = vector.broadcast %20 : vector<1x8xf32> to vector<64x8xf32>
    %23 = arith.mulf %21, %22 : vector<64x8xf32>
    %24 = arith.subf %19, %23 : vector<64x8xf32>
    %25 = vector.broadcast %16 : vector<64x1xf32> to vector<64x8xf32>
    %26 = arith.mulf %25, %24 : vector<64x8xf32>
    %c0_11 = arith.constant 0 : index
    %c0_12 = arith.constant 0 : index
    %27 = vector.load %arg4[%c0_11, %c0_12] : memref<1x8xf32, #tpu.memory_space<vmem>>, vector<1x8xf32>
    %28 = vector.broadcast %27 : vector<1x8xf32> to vector<64x8xf32>
    %29 = arith.addf %26, %28 : vector<64x8xf32>
    %c0_13 = arith.constant 0 : index
    %c0_14 = arith.constant 0 : index
    %30 = vector.load %arg6[%c0_13, %c0_14] : memref<64x8xf32, #tpu.memory_space<vmem>>, vector<64x8xf32>
    tpu.vector_store %arg6[%c0_13, %c0_14], %29 {strides = array<i32>} : memref<64x8xf32, #tpu.memory_space<vmem>>, vector<64x8xf32>,
    return
  }
  func.func @transform_0(%arg0: i32, %arg1: i32) -> (i32, i32) {
    %c0_i32 = arith.constant 0 : i32
    %c0_i32_0 = arith.constant 0 : i32
    return %arg0, %c0_i32 : i32, i32
  }
  func.func @transform_1(%arg0: i32, %arg1: i32) -> (i32, i32) {
    %c0_i32 = arith.constant 0 : i32
    %c0_i32_0 = arith.constant 0 : i32
    return %c0_i32, %arg1 : i32, i32
  }
  func.func @transform_2(%arg0: i32, %arg1: i32) -> (i32, i32) {
    %c0_i32 = arith.constant 0 : i32
    %c0_i32_0 = arith.constant 0 : i32
    return %c0_i32, %arg1 : i32, i32
  }
  func.func @transform_3(%arg0: i32, %arg1: i32) -> (i32, i32) {
    %c0_i32 = arith.constant 0 : i32
    %c0_i32_0 = arith.constant 0 : i32
    return %c0_i32, %arg1 : i32, i32
  }
  func.func @transform_4(%arg0: i32, %arg1: i32) -> (i32, i32) {
    %c0_i32 = arith.constant 0 : i32
    return %arg0, %arg1 : i32, i32
  }
}

</mosaic_0001>

<bundles_post_ra>
// kernel: tpu_custom_call.1
= control target key start
LH: loop header
LB: loop body
LE: loop exit
PB: predicated region body
PF: predicated region fallthrough
CT: control target
= control target key end

     0   :  { %s790_s15 = smov 0   ;;  %s792_s16 = smov 0   ;;  %s895_s0 = inlined_call_operand.vmem [shape: f32[128,32], index: 0, kind: input, shape index: {}]   ;;  %s896_s1 = inlined_call_operand.vmem [shape: bf16[32,8], index: 1, kind: input, shape index: {}]   ;;  %s897_s2 = inlined_call_operand.vmem [shape: f32[1,8], index: 2, kind: input, shape index: {}]   ;;  %s898_s3 = inlined_call_operand.vmem [shape: f32[1,8], index: 3, kind: input, shape index: {}]   ;;  %s899_s4 = inlined_call_operand.vmem [shape: f32[128,8], index: 4, kind: output, shape index: {}]  }
   0x1   :  { %s794_s17 = smov 0  }
   0x2 LB: > { %s26_s18 = sadd.s32 1, %s759_s16  ;;  %p662_p0 = scmp.ge.s32.totalorder %s763_s17, 1  ;;  %s763_s17 = sphi %s794_s17, %s14_s17   ;;  %s759_s16 = sphi %s792_s16, %s901_s16   ;;  %s755_s15 = sphi %s790_s15, %s900_s15  }
   0x3   : > { %p28_p1 = scmp.ge.s32.totalorder %s26_s18, 2  ;;  %p202_p2 = scmp.lt.s32.totalorder %s763_s17, 3 }
   0x5   : > { %s903_s18 = smov (%p28_p1, %s26_s18), 0  ;;  %p203_p3 = pnand %p662_p0, %p202_p2 }
   0x6   : > { %v723_v0 = vld [vmem:[%s896_s1] sm:$0xff] (!%p203_p3)   ;;  %s663_s21 = sshll.u32 (!%p203_p3), %s755_s15, 3  ;;  %v724_v1 = vld [vmem:[%s896_s1 + $0x8] sm:$0xff] (!%p203_p3)   ;;  %vm275_vm0 = vcmask (!%p203_p3), 261120   ;;  %vm532_vm1 = vcmask (!%p203_p3), 64512  }
   0x7   : > { %206 = sbr.rel (%p203_p3) target bundleno = 244 (0xf4), region = 36  ;;  %p242_p4 = scmp.lt.s32.totalorder (!%p203_p3), %s663_s21, 15  ;;  %683 = vmatprep.subr.bf16.mxu0 (!%p203_p3), %v723_v0  ;;  %695 = vmatprep.subr.bf16.mxu1 (!%p203_p3), %v723_v0 }
   0x8   : > { %684 = vmatpush3.bf16.msra.mxu0 (!%p203_p3), %v723_v0  ;;  %697 = vmatpush3.bf16.msra.mxu1 (!%p203_p3), %v723_v0 }
   0x9   : > { %685 = vmatprep.subr.bf16.mxu0 (!%p203_p3), %v724_v1  ;;  %696 = vmatprep.subr.bf16.mxu1 (!%p203_p3), %v724_v1 }
   0xc   : > { %686 = vmatpush3.bf16.msra.mxu0 (!%p203_p3), %v724_v1  ;;  %698 = vmatpush3.bf16.msra.mxu1 (!%p203_p3), %v724_v1 }
   0xe   : > { %s905_s21 = smov (!%p242_p4, %s663_s21), 15 }
   0xf   : > { %s664_s24 = sshll.u32 %s905_s21, 3 }
  0x10   : > { %s245_s27 = scalar_lea.vmem %s895_s0, %s664_s24  ;;  %s264_s8 = scalar_lea.vmem %s899_s4, %s664_s24 }
  0x11   : > { %v267_v2 = vld [vmem:[%s245_s27] sm:$0xff]  ;;  %v268_v3 = vld [vmem:[%s245_s27 + $0x8] sm:$0xff]  ;;  %v269_v7 = vld [vmem:[%s245_s27 + $0x10] sm:$0xff] }
  0x12   : > { %v271_v4 = vld [vmem:[%s245_s27 + $0x20] sm:$0xff]  ;;  %v389_v5 = vpack.c.bf16 %v268_v3, %v267_v2  ;;  %v272_v6 = vld [vmem:[%s245_s27 + $0x28] sm:$0xff]  ;;  %v270_v8 = vld [vmem:[%s245_s27 + $0x18] sm:$0xff]  ;;  %v276_v9 = vsel %vm275_vm0, %v267_v2, 0.0  ;;  %v282_v14 = vsel %vm275_vm0, %v269_v7, 0.0  ;;  %v279_v16 = vsel %vm275_vm0, %v268_v3, 0.0 }
  0x13   : > { %v391_v10 = vpack.c.bf16 %v272_v6, %v271_v4  ;;  %v390_v11 = vpack.c.bf16 %v270_v8, %v269_v7  ;;  %v273_v12 = vld [vmem:[%s245_s27 + $0x30] sm:$0xff]  ;;  %v274_v13 = vld [vmem:[%s245_s27 + $0x38] sm:$0xff]  ;;  %277 = vadd.xlane.f32.xlu0 %v276_v9  ;;  %283 = vadd.xlane.f32.xlu1 %v282_v14  ;;  %v285_v17 = vsel %vm275_vm0, %v270_v8, 0.0  ;;  %v288_v18 = vsel %vm275_vm0, %v271_v4, 0.0 }
  0x14   : > { %687 = vmatprep.mubr.msk.bf16.mxu0 %vm275_vm0, %v389_v5  ;;  %v392_v15 = vpack.c.bf16 %v274_v13, %v273_v12  ;;  %v291_v19 = vsel %vm275_vm0, %v272_v6, 0.0  ;;  %v294_v20 = vsel %vm275_vm0, %v273_v12, 0.0  ;;  %v309_v21 = vmul.f32 %v267_v2, %v267_v2 }
  0x15   : > { %691 = vmatprep.mubr.msk.bf16.mxu1 %vm275_vm0, %v391_v10  ;;  %688 = vmatmul.mubr.msk.bf16.vlgmr.msra.gmra.mrb[0].mxu0 %vm275_vm0, %v390_v11  ;;  %v297_v22 = vsel %vm275_vm0, %v274_v13, 0.0  ;;  %v310_v23 = vmul.f32 %v268_v3, %v268_v3  ;;  %v311_v25 = vmul.f32 %v269_v7, %v269_v7  ;;  %v312_v27 = vmul.f32 %v270_v8, %v270_v8 }
  0x16   : > { %692 = vmatmul.mubr.msk.bf16.vlgmr.msra.gmra.mrb[0].mxu1 %vm275_vm0, %v392_v15  ;;  %v317_v24 = vsel %vm275_vm0, %v309_v21, 0.0  ;;  %v313_v29 = vmul.f32 %v271_v4, %v271_v4  ;;  %v314_v31 = vmul.f32 %v272_v6, %v272_v6  ;;  %v315_v33 = vmul.f32 %v273_v12, %v273_v12 }
  0x17   : > { %280 = vadd.xlane.f32.xlu0 %v279_v16  ;;  %286 = vadd.xlane.f32.xlu1 %v285_v17  ;;  %v320_v26 = vsel %vm275_vm0, %v310_v23, 0.0  ;;  %v323_v28 = vsel %vm275_vm0, %v311_v25, 0.0  ;;  %v326_v30 = vsel %vm275_vm0, %v312_v27, 0.0  ;;  %v316_v35 = vmul.f32 %v274_v13, %v274_v13 }
  0x18   : > { %v329_v32 = vsel %vm275_vm0, %v313_v29, 0.0  ;;  %v332_v34 = vsel %vm275_vm0, %v314_v31, 0.0  ;;  %v335_v36 = vsel %vm275_vm0, %v315_v33, 0.0 }
  0x19   : > { %v338_v37 = vsel %vm275_vm0, %v316_v35, 0.0 }
  0x1b   : > { %289 = vadd.xlane.f32.xlu0 %v288_v18  ;;  %292 = vadd.xlane.f32.xlu1 %v291_v19 }
  0x1f   : > { %295 = vadd.xlane.f32.xlu0 %v294_v20  ;;  %298 = vadd.xlane.f32.xlu1 %v297_v22 }
  0x23   : > { %318 = vadd.xlane.f32.xlu0 %v317_v24  ;;  %321 = vadd.xlane.f32.xlu1 %v320_v26 }
  0x27   : > { %324 = vadd.xlane.f32.xlu0 %v323_v28  ;;  %327 = vadd.xlane.f32.xlu1 %v326_v30 }
  0x2b   : > { %330 = vadd.xlane.f32.xlu0 %v329_v32  ;;  %333 = vadd.xlane.f32.xlu1 %v332_v34 }
  0x2f   : > { %336 = vadd.xlane.f32.xlu0 %v335_v36  ;;  %339 = vadd.xlane.f32.xlu1 %v338_v37 }
  0xa0   : > { %v278_v38 = vpop.xlane.xlu0 %277  ;;  %v284_v39 = vpop.xlane.xlu1 %283 }
  0xa1   : > { %v842_v51 = vmul.f32 0.03125, %v278_v38  ;;  %v303_v54 = vmul.f32 0.03125, %v284_v39  ;;  %v673_v38 = vld [vmem:[%s898_s3] ss:$0 sm:$0xff] }
  0xa3   : > { %v349_v56 = vmul.f32 %v842_v51, %v842_v51  ;;  %v351_v63 = vmul.f32 %v303_v54, %v303_v54 }
  0xa4   : > { %v281_v40 = vpop.xlane.xlu0 %280  ;;  %v287_v41 = vpop.xlane.xlu1 %286 }
  0xa5   : > { %v844_v52 = vmul.f32 0.03125, %v281_v40  ;;  %v846_v55 = vmul.f32 0.03125, %v287_v41  ;;  %v495_v40 = vmul.f32 %v673_v38, %v303_v54 }
  0xa7   : > { %v350_v59 = vmul.f32 %v844_v52, %v844_v52  ;;  %v352_v2 = vmul.f32 %v846_v55, %v846_v55 }
  0xa8   : > { %v290_v42 = vpop.xlane.xlu0 %289  ;;  %v293_v43 = vpop.xlane.xlu1 %292 }
  0xa9   : > { %v305_v60 = vmul.f32 0.03125, %v290_v42  ;;  %v856_v3 = vmul.f32 0.03125, %v293_v43 }
  0xab   : > { %v353_v9 = vmul.f32 %v305_v60, %v305_v60  ;;  %v354_v15 = vmul.f32 %v856_v3, %v856_v3 }
  0xac   : > { %v296_v44 = vpop.xlane.xlu0 %295  ;;  %v299_v45 = vpop.xlane.xlu1 %298 }
  0xad   : > { %v307_v57 = vmul.f32 0.03125, %v296_v44  ;;  %v852_v0 = vmul.f32 0.03125, %v299_v45  ;;  %v493_v44 = vmul.f32 %v673_v38, %v842_v51 }
  0xaf   : > { %v355_v6 = vmul.f32 %v307_v57, %v307_v57  ;;  %v356_v12 = vmul.f32 %v852_v0, %v852_v0  ;;  %v499_v43 = vmul.f32 %v673_v38, %v307_v57  ;;  %v500_v51 = vmul.f32 %v673_v38, %v852_v0 }
  0xb0   : > { %v319_v46 = vpop.xlane.xlu0 %318  ;;  %v322_v47 = vpop.xlane.xlu1 %321 }
  0xb1   : > { %v341_v58 = vmul.f32 0.03125, %v319_v46  ;;  %v342_v61 = vmul.f32 0.03125, %v322_v47 }
  0xb3   : > { %v357_v7 = vsub.f32 %v341_v58, %v349_v56  ;;  %v358_v10 = vsub.f32 %v342_v61, %v350_v59  ;;  %v674_v56 = vld [vmem:[%s897_s2] ss:$0 sm:$0xff]  ;;  %v494_v61 = vmul.f32 %v673_v38, %v844_v52 }
  0xb4   : > { %v325_v48 = vpop.xlane.xlu0 %324  ;;  %v328_v49 = vpop.xlane.xlu1 %327 }
  0xb5   : > { %v343_v1 = vmul.f32 0.03125, %v325_v48  ;;  %v344_v4 = vmul.f32 0.03125, %v328_v49  ;;  %v365_v18 = vmax.f32 %v357_v7, 0.0  ;;  %v366_v20 = vmax.f32 %v358_v10, 0.0 }
  0xb6   : > { %v497_v49 = vmul.f32 %v673_v38, %v305_v60 }
  0xb7   : > { %v359_v13 = vsub.f32 %v343_v1, %v351_v63  ;;  %v360_v16 = vsub.f32 %v344_v4, %v352_v2  ;;  %v373_v26 = vadd.f32 1e-06, %v365_v18  ;;  %v374_v28 = vadd.f32 1e-06, %v366_v20 }
  0xb8   : > { %v331_v50 = vpop.xlane.xlu0 %330  ;;  %v334_v53 = vpop.xlane.xlu1 %333  ;;  %v498_v4 = vmul.f32 %v673_v38, %v856_v3 }
  0xb9   : > { %v345_v11 = vmul.f32 0.03125, %v331_v50  ;;  %v346_v17 = vmul.f32 0.03125, %v334_v53  ;;  %v367_v22 = vmax.f32 %v359_v13, 0.0  ;;  %v368_v24 = vmax.f32 %v360_v16, 0.0 }
  0xba   : > { %725 = vrsqrt.f32 %v373_v26  ;;  %v496_v50 = vmul.f32 %v673_v38, %v846_v55 }
  0xbb   : > { %v361_v21 = vsub.f32 %v345_v11, %v353_v9  ;;  %v362_v25 = vsub.f32 %v346_v17, %v354_v15  ;;  %v375_v30 = vadd.f32 1e-06, %v367_v22  ;;  %v376_v32 = vadd.f32 1e-06, %v368_v24 }
  0xbc   : > { %v337_v62 = vpop.xlane.xlu0 %336  ;;  %v340_v5 = vpop.xlane.xlu1 %339  ;;  %727 = vrsqrt.f32 %v374_v28 }
  0xbd   : > { %v347_v8 = vmul.f32 0.03125, %v337_v62  ;;  %v348_v14 = vmul.f32 0.03125, %v340_v5  ;;  %v369_v29 = vmax.f32 %v361_v21, 0.0  ;;  %v370_v33 = vmax.f32 %v362_v25, 0.0 }
  0xbe   : > { %729 = vrsqrt.f32 %v375_v30 }
  0xbf   : > { %v363_v19 = vsub.f32 %v347_v8, %v355_v6  ;;  %v364_v23 = vsub.f32 %v348_v14, %v356_v12  ;;  %v377_v35 = vadd.f32 1e-06, %v369_v29  ;;  %731 = vrsqrt.f32 %v376_v32 }
  0xc0   : > { %v378_v37 = vadd.f32 1e-06, %v370_v33 }
  0xc1   : > { %v371_v27 = vmax.f32 %v363_v19, 0.0  ;;  %v372_v31 = vmax.f32 %v364_v23, 0.0 }
  0xc3   : > { %v379_v34 = vadd.f32 1e-06, %v371_v27  ;;  %v380_v36 = vadd.f32 1e-06, %v372_v31 }
  0xc4   : > { %v726_v39 = vpop.eup %725 }
  0xc5   : > { %733 = vrsqrt.f32 %v379_v34 }
  0xc6   : > { %735 = vrsqrt.f32 %v377_v35  ;;  %v728_v41 = vpop.eup %727 }
  0xc7   : > { %737 = vrsqrt.f32 %v380_v36 }
  0xc8   : > { %739 = vrsqrt.f32 %v378_v37  ;;  %v730_v45 = vpop.eup %729 }
  0xc9   : > { %v732_v53 = vpop.eup %731 }
  0xcf   : > { %v734_v62 = vpop.eup %733 }
  0xd0   : > { %v736_v5 = vpop.eup %735 }
  0xd1   : > { %v738_v52 = vpop.eup %737 }
  0xd2   : > { %v740_v14 = vpop.eup %739 }
  0xe8   : > { %v689_v42 = vpop.f32.mrb[0].mxu0 }
  0xe9   : > { %v503_v46 = vsub.f32 %v689_v42, %v495_v40  ;;  %v693_v47 = vpop.f32.mrb[0].mxu1  ;;  %v455_v48 = vpop.f32.mrb[1].mxu0 }
  0xea   : > { %v507_v54 = vsub.f32 %v693_v47, %v499_v43  ;;  %v501_v58 = vsub.f32 %v455_v48, %v493_v44  ;;  %v471_v59 = vpop.f32.mrb[1].mxu1  ;;  %v690_v57 = vpop.f32.mrb[2].mxu0 }
  0xeb   : > { %v511_v63 = vmul.f32 %v730_v45, %v503_v46  ;;  %v505_v1 = vsub.f32 %v471_v59, %v497_v49  ;;  %v504_v60 = vsub.f32 %v690_v57, %v496_v50  ;;  %v694_v2 = vpop.f32.mrb[2].mxu1  ;;  %v458_v55 = vpop.f32.mrb[3].mxu0 }
  0xec   : > { %v515_v6 = vmul.f32 %v734_v62, %v507_v54  ;;  %v509_v7 = vmul.f32 %v726_v39, %v501_v58  ;;  %v508_v8 = vsub.f32 %v694_v2, %v500_v51  ;;  %v502_v0 = vsub.f32 %v458_v55, %v494_v61  ;;  %v474_v9 = vpop.f32.mrb[3].mxu1 }
  0xed   : > { %v526_v10 = vadd.f32 %v674_v56, %v511_v63  ;;  %v513_v11 = vmul.f32 %v736_v5, %v505_v1  ;;  %v512_v12 = vmul.f32 %v732_v53, %v504_v60  ;;  %v506_v13 = vsub.f32 %v474_v9, %v498_v4 }
  0xee   : > { %v530_v15 = vadd.f32 %v674_v56, %v515_v6  ;;  %v524_v16 = vadd.f32 %v674_v56, %v509_v7  ;;  %v516_v3 = vmul.f32 %v738_v52, %v508_v8  ;;  %v510_v17 = vmul.f32 %v728_v41, %v502_v0 }
  0xef   : > { %535 = vst.msk [vmem:[%s264_s8 + $0x10] sm:$0xff] %vm532_vm1, %v526_v10  ;;  %v528_v18 = vadd.f32 %v674_v56, %v513_v11  ;;  %v527_v19 = vadd.f32 %v674_v56, %v512_v12  ;;  %v514_v20 = vmul.f32 %v740_v14, %v506_v13 }
  0xf0   : > { %539 = vst.msk [vmem:[%s264_s8 + $0x30] sm:$0xff] %vm532_vm1, %v530_v15  ;;  %533 = vst.msk [vmem:[%s264_s8] sm:$0xff] %vm532_vm1, %v524_v16  ;;  %v531_v21 = vadd.f32 %v674_v56, %v516_v3  ;;  %v525_v22 = vadd.f32 %v674_v56, %v510_v17 }
  0xf1   : > { %537 = vst.msk [vmem:[%s264_s8 + $0x20] sm:$0xff] %vm532_vm1, %v528_v18  ;;  %536 = vst.msk [vmem:[%s264_s8 + $0x18] sm:$0xff] %vm532_vm1, %v527_v19  ;;  %v529_v23 = vadd.f32 %v674_v56, %v514_v20 }
  0xf2   : > { %540 = vst.msk [vmem:[%s264_s8 + $0x38] sm:$0xff] %vm532_vm1, %v531_v21  ;;  %534 = vst.msk [vmem:[%s264_s8 + $0x8] sm:$0xff] %vm532_vm1, %v525_v22 }
  0xf3   : > { %538 = vst.msk [vmem:[%s264_s8 + $0x28] sm:$0xff] %vm532_vm1, %v529_v23 }
  0xf4 PF: > { %s14_s17 = sadd.s32 1, %s763_s17   ;;  %s900_s15 = smov %s759_s16 }
  0xf5   : > { %p11_p5 = scmp.ge.s32.totalorder %s14_s17, 4   ;;  %s901_s16 = smov %s903_s18 }
  0xf7   :  { %13 = sbr.rel (!%p11_p5) target bundleno = 2 (0x2), region = 75 }

</bundles_post_ra>
